<compile_context>
chip_gen: v5e
topology: v5e:2x2
jax: 0.10.0
libtpu: 0.0.40
codegen_flags: <defaults>
</compile_context>

<pallas_src>
import jax
import jax.numpy as jnp
from jax import lax
from jax.experimental import pallas as pl
from jax.experimental.pallas import tpu as pltpu


def _structural_probe_kernel(x_ref, p_ref, o_ref, t_ref):
    # x_ref: (Bt, S, D)   word representations, native dtype
    # p_ref: (D, Rp)      zero-padded projection (same block every step -> resident)
    # o_ref: (Bt, TQ, S)  squared distances for the current query tile
    # t_ref: (Bt, S, Rp)  projected sentences, computed once per batch block
    bt, tq_rows, s = o_ref.shape
    rp = t_ref.shape[-1]
    d_model = x_ref.shape[-1]
    q = pl.program_id(1)

    @pl.when(q == 0)
    def _project():
        # One projection per batch block. Native-dtype operands on the MXU,
        # f32 accumulation via preferred_element_type (no pre-matmul upcast).
        if bt == 1:
            x2 = x_ref[0]                                   # (S, D)
        else:
            x2 = x_ref[...].reshape(bt * s, d_model)        # (Bt*S, D)
        t2 = lax.dot_general(
            x2, p_ref[...],
            dimension_numbers=(((1,), (0,)), ((), ())),
            preferred_element_type=jnp.float32,
        )
        if bt == 1:
            t_ref[0] = t2.astype(t_ref.dtype)
        else:
            t_ref[...] = t2.reshape(bt, s, rp).astype(t_ref.dtype)

    if tq_rows != s:
        start = pl.multiple_of(q * tq_rows, tq_rows)

    ones_r = jnp.ones((1, rp), jnp.float32)

    # bt is a small static constant -> this Python loop unrolls.
    for bi in range(bt):
        t_all = t_ref[bi]                                   # (S, Rp)
        if tq_rows == s:
            t_q = t_all
        else:
            t_q = t_ref[bi, pl.ds(start, tq_rows), :]       # (TQ, Rp)

        # Gram block on the MXU (contract over Rp), f32 accumulation.
        gram = lax.dot_general(
            t_q, t_all,
            dimension_numbers=(((1,), (1,)), ((), ())),
            preferred_element_type=jnp.float32,
        )                                                   # (TQ, S)

        # Squared norms: O(S*Rp) work, no SxS masks / iotas.
        t_q32 = t_q.astype(jnp.float32)
        sq_i = jnp.sum(t_q32 * t_q32, axis=-1, keepdims=True)       # (TQ, 1)
        t_all32 = t_all.astype(jnp.float32)
        sq_j = lax.dot_general(                                      # (1, S)
            ones_r, t_all32 * t_all32,
            dimension_numbers=(((1,), (1,)), ((), ())),
            preferred_element_type=jnp.float32,
        )

        # ||t_i - t_j||^2 = ||t_i||^2 + ||t_j||^2 - 2 t_i.t_j ; clamp tiny
        # negative rounding artifacts.
        dist = jnp.maximum(sq_i + sq_j - 2.0 * gram, 0.0)
        o_ref[bi] = dist.astype(o_ref.dtype)


def _vmem_limit_bytes() -> int:
    """Generation-aware VMEM cap (~38 MiB on v7x, ~76 MiB on v5e/v6e)."""
    cap = 64 * 1024 * 1024  # conservative default: v7x physical per-TC VMEM
    try:
        info = pltpu.get_tpu_info()
        cap = int(getattr(info, "vmem_capacity_bytes", cap) or cap)
    except Exception:
        pass
    return min(int(cap * 0.6), 96 * 1024 * 1024)


def _estimate_vmem(bt, tq, S, D, Rp, in_isz, p_isz, out_isz):
    x_bytes = 2 * bt * S * D * in_isz            # double-buffered input block
    p_bytes = 2 * D * Rp * p_isz                 # resident projection (2 bufs)
    o_bytes = 2 * bt * tq * S * out_isz          # double-buffered output block
    t_bytes = bt * S * Rp * 4                    # t scratch (f32 upper bound)
    tmp_bytes = 4 * (2 * bt * tq * S + 2 * bt * S * Rp)   # gram/dist/squares
    return x_bytes + p_bytes + o_bytes + t_bytes + tmp_bytes


def _choose_tiles(B, S, D, Rp, in_isz, p_isz, out_isz, budget):
    # Sentences per grid step: as many as fit in the budget, but keep >= 2
    # batch blocks when B > 1 so both v7x TensorCores get work.
    bt_cap = min(B, 8)
    if B > 1:
        bt_cap = min(bt_cap, max(1, B // 2))
    bt = 1
    for cand in range(bt_cap, 0, -1):
        if B % cand == 0 and _estimate_vmem(cand, S, S, D, Rp,
                                            in_isz, p_isz, out_isz) <= budget:
            bt = cand
            break
    # Query tiling inside a sentence when the full (bt, S, S) output block
    # does not fit VMEM (large S; mostly a v7x concern).
    tq = S
    if _estimate_vmem(bt, S, S, D, Rp, in_isz, p_isz, out_isz) > budget:
        cand = (S // 8) * 8
        while cand >= 8:
            if S % cand == 0 and _estimate_vmem(bt, cand, S, D, Rp,
                                                in_isz, p_isz, out_isz) <= budget:
                tq = cand
                break
            cand -= 8
    return bt, tq


def structural_probe_forward(batch, proj):
    """Pallas implementation of StructuralProbe.forward.

    Args:
      batch: (B, S, D) word representations (any float dtype; used natively).
      proj:  (D, R) projection matrix.
    Returns:
      (B, S, S) squared pairwise distances, in batch.dtype.
    """
    B, S, D = batch.shape
    D2, R = proj.shape
    assert D == D2, (D, D2)
    out_dtype = batch.dtype

    # Zero-pad the probe rank to a lane-dense multiple of 128: extra zero
    # columns add nothing to the norms / Gram matrix, so distances are
    # unchanged, and both matmuls become lane-aligned.
    Rp = ((R + 127) // 128) * 128
    proj_in = jnp.pad(proj, ((0, 0), (0, Rp - R))) if Rp != R else proj

    in_isz = jnp.dtype(batch.dtype).itemsize
    p_isz = jnp.dtype(proj_in.dtype).itemsize
    out_isz = jnp.dtype(out_dtype).itemsize
    # Operand dtype for the resident t scratch: keeps the Gram matmul fed with
    # native-width operands (bf16 stays bf16); f32 inputs stay f32.
    t_dtype = jnp.promote_types(batch.dtype, proj.dtype)

    vmem_limit = _vmem_limit_bytes()
    budget = int(vmem_limit * 0.55)   # headroom for compiler-internal scratch
    Bt, TQ = _choose_tiles(B, S, D, Rp, in_isz, p_isz, out_isz, budget)
    num_b = B // Bt
    num_q = S // TQ

    flops = (2 * B * S * D * Rp            # projection
             + 2 * B * S * S * Rp          # Gram blocks
             + 2 * B * num_q * S * Rp      # per-step key-norm matmuls
             + 6 * B * S * S)              # distance epilogue
    bytes_accessed = (B * S * D * in_isz + D * Rp * p_isz + B * S * S * out_isz)

    return pl.pallas_call(
        _structural_probe_kernel,
        out_shape=jax.ShapeDtypeStruct((B, S, S), out_dtype),
        grid_spec=pltpu.PrefetchScalarGridSpec(
            num_scalar_prefetch=0,
            grid=(num_b, num_q),
            in_specs=[
                # Sentence block: same block across the q axis -> fetched once
                # per batch block. Last two dims equal full extents, so any
                # (S, D) is legal w.r.t. the (8, 128) rule.
                pl.BlockSpec((Bt, S, D), lambda b, q: (b, 0, 0)),
                # Projection: identical block index every step -> VMEM resident.
                pl.BlockSpec((D, Rp), lambda b, q: (0, 0)),
            ],
            out_specs=pl.BlockSpec((Bt, TQ, S), lambda b, q: (b, q, 0)),
            scratch_shapes=[pltpu.VMEM((Bt, S, Rp), t_dtype)],
        ),
        compiler_params=pltpu.CompilerParams(
            # Batch blocks are independent (v7x can shard them across both
            # TensorCores); the query axis carries the t scratch -> arbitrary.
            dimension_semantics=("parallel", "arbitrary"),
            vmem_limit_bytes=vmem_limit,
        ),
        cost_estimate=pl.CostEstimate(
            flops=flops, transcendentals=0, bytes_accessed=bytes_accessed
        ),
    )(batch, proj_in)


def _reference(batch, proj):
    """Pure-JAX reference mirroring the PyTorch module exactly."""
    t = jnp.matmul(batch, proj)                         # (B, S, R)
    diffs = t[:, :, None, :] - t[:, None, :, :]         # (B, S, S, R)
    return jnp.sum(diffs * diffs, axis=-1)              # (B, S, S)


if __name__ == "__main__":
    B, S, D, R = 2, 8, 32, 16
    key = jax.random.PRNGKey(0)
    k_batch, k_proj = jax.random.split(key)

    batch = jax.random.normal(k_batch, (B, S, D), dtype=jnp.float32)
    # Matches nn.init.uniform_(self.proj, -0.05, 0.05).
    proj = jax.random.uniform(
        k_proj, (D, R), dtype=jnp.float32, minval=-0.05, maxval=0.05
    )

    dists = structural_probe_forward(batch, proj)
    jax.block_until_ready(dists)

    ref = _reference(batch, proj)
    assert dists.shape == (B, S, S), dists.shape
    # The Gram-identity formulation can differ from the broadcast-diff
    # reference by cancellation on near-identical rows -> slightly loose tol.
    assert jnp.allclose(dists, ref, rtol=5e-4, atol=1e-5), (
        float(jnp.max(jnp.abs(dists - ref)))
    )

    print("KERNEL_OK")
</pallas_src>

<mosaic_0001>
module attributes {stable_mosaic.version = 11 : i64} {
  func.func @_structural_probe_kernel(%arg0: i32, %arg1: i32, %arg2: memref<1x8x32xf32, #tpu.memory_space<vmem>>, %arg3: memref<32x128xf32, #tpu.memory_space<vmem>>, %arg4: memref<1x8x8xf32, #tpu.memory_space<vmem>>, %arg5: memref<1x8x128xf32, #tpu.memory_space<vmem>>) attributes {dimension_semantics = [#tpu.dimension_semantics<parallel>, #tpu.dimension_semantics<arbitrary>], iteration_bounds = array<i64: 2, 1>, scalar_prefetch = 0 : i64, scratch_operands = 1 : i64, tpu.core_type = #tpu.core_type<tc>, window_params = [{transform_indices = @transform_0, window_bounds = array<i64: 1, 8, 32>}, {pipeline_mode = #tpu.pipeline_mode<synchronous>, transform_indices = @transform_1, window_bounds = array<i64: 32, 128>}, {transform_indices = @transform_2, window_bounds = array<i64: 1, 8, 8>}]} {
    %c0_i32 = arith.constant 0 : i32
    %0 = arith.cmpi eq, %arg1, %c0_i32 : i32
    %1 = arith.extui %0 : i1 to i32
    %c0_i32_0 = arith.constant 0 : i32
    %2 = arith.cmpi ne, %1, %c0_i32_0 : i32
    scf.if %2 {
      %c0_11 = arith.constant 0 : index
      %c0_12 = arith.constant 0 : index
      %c0_13 = arith.constant 0 : index
      %23 = vector.load %arg2[%c0_11, %c0_12, %c0_13] : memref<1x8x32xf32, #tpu.memory_space<vmem>>, vector<1x8x32xf32>
      %24 = vector.shape_cast %23 : vector<1x8x32xf32> to vector<8x32xf32>
      %c0_14 = arith.constant 0 : index
      %c0_15 = arith.constant 0 : index
      %25 = vector.load %arg3[%c0_14, %c0_15] : memref<32x128xf32, #tpu.memory_space<vmem>>, vector<32x128xf32>
      %cst_16 = arith.constant dense<0.000000e+00> : vector<8x128xf32>
      %26 = tpu.matmul %24, %25, %cst_16 {dimension_numbers = #tpu.dot_dimension_numbers<[1], [0], [0], [1], [0, 0, 1, 1], [], []>} : vector<8x32xf32>, vector<32x128xf32>, vector<8x128xf32> -> vector<8x128xf32>
      %c0_17 = arith.constant 0 : index
      %c0_18 = arith.constant 0 : index
      %c0_19 = arith.constant 0 : index
      %27 = vector.load %arg5[%c0_17, %c0_18, %c0_19] : memref<1x8x128xf32, #tpu.memory_space<vmem>>, vector<1x8x128xf32>
      %28 = vector.shape_cast %27 : vector<1x8x128xf32> to vector<8x128xf32>
      %29 = vector.shape_cast %26 : vector<8x128xf32> to vector<1x8x128xf32>
      tpu.vector_store %arg5[%c0_17, %c0_18, %c0_19], %29 {strides = array<i32>} : memref<1x8x128xf32, #tpu.memory_space<vmem>>, vector<1x8x128xf32>,
    } else {
    }
    %cst = arith.constant 1.000000e+00 : f32
    %3 = vector.broadcast %cst : f32 to vector<1x128xf32>
    %c0 = arith.constant 0 : index
    %c0_1 = arith.constant 0 : index
    %c0_2 = arith.constant 0 : index
    %4 = vector.load %arg5[%c0, %c0_1, %c0_2] : memref<1x8x128xf32, #tpu.memory_space<vmem>>, vector<1x8x128xf32>
    %5 = vector.shape_cast %4 : vector<1x8x128xf32> to vector<8x128xf32>
    %cst_3 = arith.constant dense<0.000000e+00> : vector<8x8xf32>
    %6 = tpu.matmul %5, %5, %cst_3 {dimension_numbers = #tpu.dot_dimension_numbers<[1], [1], [0], [0], [0, 0, 1, 0], [], []>} : vector<8x128xf32>, vector<8x128xf32>, vector<8x8xf32> -> vector<8x8xf32>
    %7 = arith.mulf %5, %5 : vector<8x128xf32>
    %cst_4 = arith.constant dense<0.000000e+00> : vector<8xf32>
    %8 = vector.multi_reduction <add>, %7, %cst_4 [1] : vector<8x128xf32> to vector<8xf32>
    %9 = vector.shape_cast %8 : vector<8xf32> to vector<8x1xf32>
    %10 = arith.mulf %5, %5 : vector<8x128xf32>
    %cst_5 = arith.constant dense<0.000000e+00> : vector<1x8xf32>
    %11 = tpu.matmul %3, %10, %cst_5 {dimension_numbers = #tpu.dot_dimension_numbers<[1], [1], [0], [0], [0, 0, 1, 0], [], []>} : vector<1x128xf32>, vector<8x128xf32>, vector<1x8xf32> -> vector<1x8xf32>
    %12 = vector.broadcast %9 : vector<8x1xf32> to vector<8x8xf32>
    %13 = vector.broadcast %11 : vector<1x8xf32> to vector<8x8xf32>
    %14 = arith.addf %12, %13 : vector<8x8xf32>
    %cst_6 = arith.constant 2.000000e+00 : f32
    %15 = vector.broadcast %cst_6 : f32 to vector<8x8xf32>
    %16 = arith.mulf %15, %6 : vector<8x8xf32>
    %17 = arith.subf %14, %16 : vector<8x8xf32>
    %cst_7 = arith.constant 0.000000e+00 : f32
    %18 = vector.broadcast %cst_7 : f32 to vector<8x8xf32>
    %19 = arith.maximumf %17, %18 : vector<8x8xf32>
    %c0_8 = arith.constant 0 : index
    %c0_9 = arith.constant 0 : index
    %c0_10 = arith.constant 0 : index
    %20 = vector.load %arg4[%c0_8, %c0_9, %c0_10] : memref<1x8x8xf32, #tpu.memory_space<vmem>>, vector<1x8x8xf32>
    %21 = vector.shape_cast %20 : vector<1x8x8xf32> to vector<8x8xf32>
    %22 = vector.shape_cast %19 : vector<8x8xf32> to vector<1x8x8xf32>
    tpu.vector_store %arg4[%c0_8, %c0_9, %c0_10], %22 {strides = array<i32>} : memref<1x8x8xf32, #tpu.memory_space<vmem>>, vector<1x8x8xf32>,
    return
  }
  func.func @transform_0(%arg0: i32, %arg1: i32) -> (i32, i32, i32) {
    %c0_i32 = arith.constant 0 : i32
    %c0_i32_0 = arith.constant 0 : i32
    %c0_i32_1 = arith.constant 0 : i32
    return %arg0, %c0_i32, %c0_i32_0 : i32, i32, i32
  }
  func.func @transform_1(%arg0: i32, %arg1: i32) -> (i32, i32) {
    %c0_i32 = arith.constant 0 : i32
    %c0_i32_0 = arith.constant 0 : i32
    %c0_i32_1 = arith.constant 0 : i32
    return %c0_i32, %c0_i32_0 : i32, i32
  }
  func.func @transform_2(%arg0: i32, %arg1: i32) -> (i32, i32, i32) {
    %c0_i32 = arith.constant 0 : i32
    %c0_i32_0 = arith.constant 0 : i32
    return %arg0, %arg1, %c0_i32 : i32, i32, i32
  }
}

</mosaic_0001>

<bundles_post_ra>
// kernel: tpu_custom_call.1
= control target key start
LH: loop header
LB: loop body
LE: loop exit
PB: predicated region body
PF: predicated region fallthrough
CT: control target
= control target key end

     0   :  { %7 = vsyncpa [#allocation4], 0  ;;  %s789_s0 = inlined_call_operand.hbm [shape: f32[2,8,32], index: 0, kind: input, shape index: {}]   ;;  %s790_s1 = inlined_call_operand.hbm [shape: f32[32,128], index: 1, kind: input, shape index: {}]   ;;  %s791_s2 = inlined_call_operand.hbm [shape: f32[2,8,8], index: 2, kind: output, shape index: {}]  }
   0x1   :  { %9 = vsyncpa [#allocation4 + $0x1], 0 }
   0x2   :  { %10 = vsyncpa [#allocation7], 0 }
   0x3   :  { %11 = vsyncpa [#allocation5], 0 }
   0x4   :  { %13 = vsyncpa [#allocation5 + $0x1], 0  ;;  %s642_s9 = smov 0   ;;  %s644_s10 = smov 0  }
   0x5   :  { %s646_s11 = smov 0   ;;  %s648_s12 = smov 0  }
   0x6   :  { %s650_s13 = smov 0   ;;  %s652_s14 = smov 0  }
   0x7 LB: > { %s383_s15 = sadd.s32 4294967295, %s621_s14   ;;  %p385_p0 = scmp.ge.s32.totalorder %s621_s14, 1  ;;  %s621_s14 = sphi %s652_s14, %s19_s14   ;;  %s617_s13 = sphi %s650_s13, %s802_s13   ;;  %s613_s12 = sphi %s648_s12, %s801_s12   ;;  %s609_s11 = sphi %s646_s11, %s800_s11   ;;  %s605_s10 = sphi %s644_s10, %s799_s10   ;;  %s601_s9 = sphi %s642_s9, %s798_s9  }
   0x8   : > { %p674_p1 = scmp.eq.s32.totalorder %s383_s15, 0  ;;  %p111_p2 = scmp.lt.s32.totalorder %s621_s14, 3 }
   0x9   : > { %s122_s19 = sshll.u32 %s790_s1, 4  ;;  %s623_s21 = smov [#allocation6]   ;;  %s123_s19 = int_to_ptr.hbm [resolvable:$true] %s122_s19 }
   0xa   : > { %p682_p3 = pnand %p385_p0, %p111_p2  ;;  %s124_s22 = sshll.u32 %s623_s21, 4  ;;  %s125_s22 = int_to_ptr.vmem [resolvable:$true] %s124_s22 }
   0xb   : > { %p387_p6 = scmp.ge.s32.totalorder %s621_s14, 2  ;;  %s624_s23 = smov 128  }
   0xc   : > { %p407_p4 = pneg %p682_p3  ;;  %s625_s24 = smov 8  }
   0xd   : > { %s384_s25 = sadd.s32 4294967294, %s621_s14   ;;  %s31_s26 = sadd.s32 1, %s617_s13 }
   0xe   : > { %p408_p5 = pnand %p407_p4, %p674_p1  ;;  %s38_s27 = sadd.s32 1, %s609_s11 }
   0xf   : > { %p33_p7 = scmp.ge.s32.totalorder %s31_s26, 2  ;;  %p45_p8 = scmp.ne.s32.totalorder %s609_s11, %s605_s10 }
  0x10   : > { %410 = dma.hbm_to_vmem [thread:$0]  (!%p408_p5), %s123_s19, 512, %s125_s22, [#allocation7], %s624_s23, %s624_s23, %s625_s24  }
  0x11   : > { %p46_p9 = scmp.eq.s32.totalorder %s621_s14, 0  ;;  %p51_p10 = scmp.ne.s32.totalorder %s605_s10, %s601_s9 }
  0x12   : > { %s804_s26 = smov (%p33_p7, %s31_s26), 0  ;;  %p98_p13 = scmp.eq.s32.totalorder %s383_s15, 1 }
  0x13   : > { %p701_p11 = por %p46_p9, %p45_p8  ;;  %p707_p12 = por %p674_p1, %p51_p10 }
  0x14   : > { %s35_s30 = ssub.s32 %s617_s13, %s804_s26  ;;  %p104_p2 = scmp.eq.s32.totalorder %s384_s25, 1 }
  0x15   : > { %p36_p0 = scmp.eq.s32.totalorder %s35_s30, 0  ;;  %p713_p4 = por %p98_p13, %p45_p8 }
  0x16   : > { %p420_p5 = scmp.lt.s32.totalorder %s621_s14, 2  ;;  %p721_p7 = por %p104_p2, %p51_p10 }
  0x17   : > { %s719_s4 = scalar_select %p36_p0, %s609_s11, %s38_s27  }
  0x18   : > { %s138_s6 = sand.u32 1, %s609_s11   ;;  %s389_s8 = sshll.u32 %s617_s13, 3 }
  0x19   : > { %s388_s7 = sshll.u32 %s138_s6, 3  ;;  %s146_s15 = scalar_lea.hbm %s789_s0, %s389_s8 }
  0x1a   : > { %s142_s19 = scalar_lea.vmem [#allocation3], %s388_s7  ;;  %s148_s22 = sshll.u32 %s146_s15, 4  ;;  %s149_s22 = int_to_ptr.hbm [resolvable:$true] %s148_s22 }
  0x1b   : > { %s150_s21 = sshll.u32 %s142_s19, 4  ;;  %p412_p8 = pnand %p420_p5, %p701_p11  ;;  %s151_s21 = int_to_ptr.vmem [resolvable:$true] %s150_s21 }
  0x1c   : > { %s139_s23 = scalar_lea.sflag [#allocation4], %s138_s6  ;;  %159 = sbr.rel (%p682_p3) target bundleno = 318 (0x13e), region = 28 }
  0x1d   : > { %414 = dma.hbm_to_vmem [thread:$0]  (!%p412_p8), %s149_s22, 128, %s151_s21, %s139_s23  }
  0x1e   : > { %s735_s24 = sand.u32 (!%p682_p3), 1, %s605_s10  }
  0x1f   : > { %s391_s25 = sshll.u32 (!%p682_p3), %s735_s24, 3  ;;  %s162_s27 = scalar_lea.sflag (!%p682_p3), [#allocation4], %s735_s24 }
  0x20   : > { %s165_s30 = scalar_lea.vmem (!%p682_p3), [#allocation3], %s391_s25 }
  0x21   : > { %588 = dma.done.wait (%p707_p12), %s162_s27, 128  }
  0x22   : > { %590 = vsyncadd (%p707_p12), %s162_s27, 4294967168 }
  0x23   : > { %592 = dma.done.wait (%p674_p1), [#allocation7], 512  }
  0x24   : > { %594 = vsyncadd (%p674_p1), [#allocation7], 4294966784  ;;  %v200_v0 = vld [vmem:[#allocation6 + $0x18] sm:$0xff]  ;;  %v199_v1 = vld [vmem:[#allocation6 + $0x10] sm:$0xff]  ;;  %vm201_vm0 = vcmask 261120   ;;  %v626_v7 = vmov 1.0  }
  0x25   : > { %217 = vmatpush.msra.mxu0 %v200_v0  ;;  %v198_v2 = vld [vmem:[#allocation6 + $0x8] sm:$0xff]  ;;  %v197_v3 = vld [vmem:[#allocation6] sm:$0xff]  ;;  %v196_v4 = vld [vmem:[%s165_s30] sm:$0xff]  ;;  %s396_s16 = sshll.u32 %s613_s12, 3  ;;  %s191_s6 = scalar_lea.vmem [#allocation8], %s391_s25  ;;  %vm275_vm1 = vcmask 64512  }
  0x26   : > { %s289_s29 = scalar_lea.hbm %s791_s2, %s396_s16  ;;  %s291_s7 = sshll.u32 %s191_s6, 4  ;;  %s292_s7 = int_to_ptr.vmem [resolvable:$true] %s291_s7 }
  0x27   : > { %218 = vmatpush.msra.mxu0 %v199_v1  ;;  %s293_s8 = sshll.u32 %s289_s29, 4  ;;  %s278_s12 = scalar_lea.sflag [#allocation5], %s735_s24  ;;  %s294_s8 = int_to_ptr.hbm [resolvable:$true] %s293_s8 }
  0x28   : > { %s549_s17 = sshra.s32 %s294_s8, 4  ;;  %s555_s21 = scalar_lea.hbm %s791_s2, 16  ;;  %s550_s17 = int_to_ptr.hbm [resolvable:$true] %s549_s17 }
  0x29   : > { %219 = vmatpush.msra.mxu0 %v198_v2  ;;  %s551_s18 = scalar_lea.hbm %s550_s17, 8  ;;  %p556_p10 = scmp.lt.s32.totalorder %s550_s17, %s791_s2 }
  0x2a   : > { %p552_p1 = scmp.ne.s32.totalorder %s550_s17, %s551_s18  ;;  %p557_p11 = scmp.lt.s32.totalorder %s555_s21, %s551_s18 }
  0x2b   : > { %220 = vmatpush.msra.mxu0 %v197_v3 }
  0x2c   : > { %394 = vmatmul.msk.f32.vlgmr.msra.gmra.mxu0 %vm201_vm0, %v196_v4  ;;  %p553_p3 = pnand %p552_p1, %p713_p4  ;;  %p558_p12 = por %p557_p11, %p556_p10 }
  0x2e   : > { %p554_p9 = pneg %p553_p3 }
  0x30   : > { %p559_p13 = pnand %p558_p12, %p554_p9 }
  0xa9   : > { %v222_v5 = vpop.f32.mrf.mxu0 }
  0xaa   : > { %242 = vmatpush.xpose.msra.mxu1 %v222_v5  ;;  %v247_v6 = vmul.f32 %v222_v5, %v222_v5 }
  0xac   : > { %248 = vadd.xlane.f32.xlu0 %v247_v6  ;;  %265 = vmatpush.xpose.msra.mxu2 %v247_v6 }
  0xad   : > { %243 = vmatmul.f32.vlgmr.msra.gmra.mxu1 %v222_v5 }
  0xaf   : > { %266 = vmatmul.f32.vlgmr.msra.gmra.mxu2 %v626_v7 }
 0x11f   : > { %v249_v11 = vpop.xlane.xlu0 %248 }
 0x12a   : > { %v244_v8 = vpop.f32.mrf.mxu1 }
 0x12b   : > { %v272_v12 = vmul.f32 2.0, %v244_v8 }
 0x132   : > { %v267_v9 = vpop.f32.mrf.mxu2 }
 0x133   : > { %v270_v10 = vperm.slane %v267_v9, 0 }
 0x135   : > { %v271_v13 = vadd.f32 %v270_v10, %v249_v11 }
 0x137   : > { %v273_v14 = vsub.f32 %v271_v13, %v272_v12 }
 0x139   : > { %v274_v15 = vmax.f32 %v273_v14, 0.0 }
 0x13b   : > { %276 = vst.msk [vmem:[%s191_s6] sm:$0xff] %vm275_vm1, %v274_v15 }
 0x13c   : > { %562 = shalt.err (!%p559_p13)
}
 0x13d   : > { %405 = dma.vmem_to_hbm [thread:$0]  (%p713_p4), %s292_s7, 128, %s294_s8, %s278_s12  }
 0x13e PF: > { %s305_s24 = sand.u32 1, %s601_s9   ;;  %p416_p0 = pnand %p387_p6, %p721_p7 }
 0x13f   : > { %s306_s25 = scalar_lea.sflag [#allocation5], %s305_s24 }
 0x140   : > { %p417_p2 = pneg %p416_p0 }
 0x142   : > { %596 = dma.done.wait (%p417_p2), %s306_s25, 128  }
 0x143   : > { %598 = vsyncadd (%p417_p2), %s306_s25, 4294967168  ;;  %s19_s14 = sadd.s32 1, %s621_s14   ;;  %s798_s9 = smov %s605_s10 }
 0x144   : > { %p16_p5 = scmp.ge.s32.totalorder %s19_s14, 4   ;;  %s799_s10 = smov %s609_s11 }
 0x145   : > { %s800_s11 = smov %s719_s4  ;;  %s801_s12 = smov %s617_s13 }
 0x146   : > { %s802_s13 = smov %s804_s26  ;;  %18 = sbr.rel (!%p16_p5) target bundleno = 7 (0x7), region = 81 }
 0x14b   :  { %312 = vsyncpa [#allocation4], 1 }
 0x14c   :  { %314 = vsyncpa [#allocation4 + $0x1], 1 }
 0x14d   :  { %315 = vsyncpa [#allocation7], 1 }
 0x14e   :  { %316 = vsyncpa [#allocation5], 1 }
 0x14f   :  { %318 = vsyncpa [#allocation5 + $0x1], 1 }

</bundles_post_ra>
